<compile_context>
chip_gen: v6e
topology: v6e:2x2x1
jax: 0.10.0
libtpu: 0.0.40
codegen_flags: <defaults>
</compile_context>

<pallas_src>
import functools

import jax
import jax.numpy as jnp
from jax.experimental import pallas as pl
from jax.experimental.pallas import tpu as pltpu

_MiB = 1024 * 1024


# ----------------------------- block sizing ---------------------------------

def _divisors_desc(n):
    return [d for d in range(n, 0, -1) if n % d == 0]


def _aligned_divisors(n, align):
    """Valid block sizes for a layout-constrained dim: multiples of `align`
    or the full dimension, descending."""
    return [d for d in _divisors_desc(n) if d == n or d % align == 0]


def _vmem_budget_bytes():
    """Per-input-block byte budget, scaled to the chip's physical VMEM."""
    cap = 64 * _MiB                      # assume the smallest fleet VMEM (v7x)
    try:
        cap = int(pltpu.get_tpu_info().vmem_capacity_bytes)
    except Exception:
        pass
    # Double-buffered input block + outputs must stay well under physical
    # VMEM: ~8 MiB blocks on v7x (64 MiB), ~16 MiB on v5e/v6e (128 MiB).
    return int(min(24 * _MiB, max(4 * _MiB, cap // 8)))


def _vmem_limit_bytes(budget):
    """Scoped-VMEM limit: 2x (double-buffered) input block + headroom."""
    return int(min(96 * _MiB, max(32 * _MiB, 4 * budget)))


def _pick_pool_blocks(n, c, hw, itemsize, budget):
    """(batch_block, hw_block) for stage 1, maximizing block size in budget."""
    hw_opts = _aligned_divisors(hw, 128)
    nb_opts = _aligned_divisors(n, 8)
    best = None
    for nb in nb_opts:
        for hwt in hw_opts:
            if nb * c * hwt * itemsize <= budget:
                if best is None or nb * hwt > best[0] * best[1]:
                    best = (nb, hwt)
                break                      # descending: first fit is biggest hw
    if best is None:
        # Even the smallest tile of a full channel slab exceeds the budget.
        # TODO(synk): add a channel-tiled partial reduce (grid axis over C with
        # running sum/max scratch) instead of oversubscribing VMEM here.
        best = (nb_opts[-1], hw_opts[-1])
    return best


def _pick_batch_block(n, per_sample_bytes, budget):
    opts = _aligned_divisors(n, 8)
    for nb in opts:
        if nb * per_sample_bytes <= budget:
            return nb
    return opts[-1]


# ------------------------- stage 1: channel pooling -------------------------

def _pool_kernel(x_ref, avg_ref, max_ref):
    """x_ref: (nb, C, hw) -> avg_ref/max_ref: (nb, hw) channel mean / max."""
    x = x_ref[...]
    avg_ref[...] = jnp.mean(x, axis=1, dtype=jnp.float32)
    max_ref[...] = jnp.max(x, axis=1).astype(jnp.float32)


# ------------------- stage 2: KxK conv (2 -> 1) + sigmoid -------------------

def _conv_sigmoid_kernel(w_ref, row_ref, col_ref, a_ref, m_ref, o_ref,
                         *, K, pad, H, W):
    """Lane-dense KxK 'same' conv over two pooled planes, then sigmoid.

    w_ref: (2*K*K,) f32 in SMEM; row_ref/col_ref: (1, HW) int32 spatial
    indices; a_ref/m_ref: (nb, HW) f32 mean/max planes; o_ref: (nb, HW).
    """
    HW = H * W
    a = a_ref[...]
    m = m_ref[...]
    row = row_ref[...]
    col = col_ref[...]

    # Hoisted per-offset boundary masks (valid source row / column).
    row_ok = [(row + (dy - pad) >= 0) & (row + (dy - pad) < H) for dy in range(K)]
    col_ok = [(col + (dx - pad) >= 0) & (col + (dx - pad) < W) for dx in range(K)]

    acc = jnp.zeros(a.shape, jnp.float32)
    for dy in range(K):                              # fully unrolled KxK taps
        for dx in range(K):
            s = (dy - pad) * W + (dx - pad)          # flat source offset
            if s == 0:
                a_s, m_s = a, m
            else:
                shift = (-s) % HW                    # out[p] <- plane[p + s]
                a_s = pltpu.roll(a, shift, axis=1)   # XLU lane rotation
                m_s = pltpu.roll(m, shift, axis=1)
            wa = w_ref[dy * K + dx]                  # weight[0, 0, dy, dx]
            wm = w_ref[K * K + dy * K + dx]          # weight[0, 1, dy, dx]
            ok = jnp.logical_and(row_ok[dy], col_ok[dx])
            acc = acc + jnp.where(ok, wa * a_s + wm * m_s, 0.0)

    o_ref[...] = jax.nn.sigmoid(acc).astype(o_ref.dtype)


# --------------------------------- wrapper ----------------------------------

def spatial_attention(x, weight):
    """x: (N, C, H, W); weight: (1, 2, K, K). Returns attention map (N, 1, H, W)."""
    N, C, H, W = x.shape
    O, I, K, K2 = weight.shape
    assert O == 1 and I == 2 and K == K2, "weight must have shape (1, 2, K, K)"
    assert K % 2 == 1, "only odd kernel sizes match PyTorch padding=K//2 ('same')"
    pad = (K - 1) // 2
    HW = H * W
    itemsize = jnp.dtype(x.dtype).itemsize

    budget = _vmem_budget_bytes()
    vlimit = _vmem_limit_bytes(budget)

    # -------- stage 1: lane-dense channel mean/max pooling --------
    x_flat = x.reshape(N, C, HW)                     # free, contiguous view
    nb1, hw_t = _pick_pool_blocks(N, C, HW, itemsize, budget)
    avg2, max2 = pl.pallas_call(
        _pool_kernel,
        out_shape=(jax.ShapeDtypeStruct((N, HW), jnp.float32),
                   jax.ShapeDtypeStruct((N, HW), jnp.float32)),
        grid_spec=pltpu.PrefetchScalarGridSpec(
            num_scalar_prefetch=0,
            grid=(N // nb1, HW // hw_t),
            in_specs=[pl.BlockSpec((nb1, C, hw_t), lambda i, j: (i, 0, j))],
            out_specs=[pl.BlockSpec((nb1, hw_t), lambda i, j: (i, j)),
                       pl.BlockSpec((nb1, hw_t), lambda i, j: (i, j))],
        ),
        compiler_params=pltpu.CompilerParams(
            dimension_semantics=("parallel", "parallel"),
            vmem_limit_bytes=vlimit),
        cost_estimate=pl.CostEstimate(
            flops=2 * N * C * HW,
            transcendentals=0,
            bytes_accessed=N * C * HW * itemsize + 2 * N * HW * 4),
    )(x_flat)
    # TODO(synk): stage 2 could be fused into stage 1 (conv on pooled planes
    # while still in VMEM) to skip the small f32 round trip; needs HW halos.

    # -------- stage 2: lane-dense KxK conv over the pooled planes + sigmoid -
    w_flat = weight.astype(jnp.float32).reshape(-1)  # (2*K*K,) SMEM scalars
    ids = jnp.arange(HW, dtype=jnp.int32)
    rowid = (ids // W).reshape(1, HW)
    colid = (ids % W).reshape(1, HW)

    per_sample2 = 16 * HW * 4                        # f32 in-kernel footprint + slack
    nb2 = _pick_batch_block(N, per_sample2, budget)
    att = pl.pallas_call(
        functools.partial(_conv_sigmoid_kernel, K=K, pad=pad, H=H, W=W),
        out_shape=jax.ShapeDtypeStruct((N, HW), x.dtype),
        grid_spec=pltpu.PrefetchScalarGridSpec(
            num_scalar_prefetch=0,
            grid=(N // nb2,),
            in_specs=[
                pl.BlockSpec(memory_space=pltpu.MemorySpace.SMEM),  # conv weights
                pl.BlockSpec((1, HW), lambda i: (0, 0)),            # row indices
                pl.BlockSpec((1, HW), lambda i: (0, 0)),            # col indices
                pl.BlockSpec((nb2, HW), lambda i: (i, 0)),          # mean plane
                pl.BlockSpec((nb2, HW), lambda i: (i, 0)),          # max plane
            ],
            out_specs=pl.BlockSpec((nb2, HW), lambda i: (i, 0)),
        ),
        compiler_params=pltpu.CompilerParams(
            dimension_semantics=("parallel",),
            vmem_limit_bytes=vlimit),
        cost_estimate=pl.CostEstimate(
            flops=(4 * K * K + 4) * N * HW,
            transcendentals=N * HW,
            bytes_accessed=2 * N * HW * 4 + N * HW * itemsize + 2 * K * K * 4),
    )(w_flat, rowid, colid, avg2, max2)

    return att.reshape(N, 1, H, W)


def spatial_attention_ref(x, weight):
    """Pure-JAX reference mirroring the PyTorch forward."""
    avg = jnp.mean(x, axis=1, keepdims=True)
    mx = jnp.max(x, axis=1, keepdims=True)
    y = jnp.concatenate([avg, mx], axis=1)           # (N, 2, H, W)
    pad = (weight.shape[-1] - 1) // 2
    out = jax.lax.conv_general_dilated(
        y, weight, window_strides=(1, 1),
        padding=((pad, pad), (pad, pad)),
        dimension_numbers=("NCHW", "OIHW", "NCHW"))
    return jax.nn.sigmoid(out)


if __name__ == "__main__":
    N, C, H, W = 2, 4, 16, 16
    K = 7
    key = jax.random.PRNGKey(0)
    kx, kw = jax.random.split(key)
    x = jax.random.normal(kx, (N, C, H, W), jnp.float32)
    weight = 0.2 * jax.random.normal(kw, (1, 2, K, K), jnp.float32)

    out = spatial_attention(x, weight)
    out = jax.block_until_ready(out)

    ref = spatial_attention_ref(x, weight)
    assert out.shape == (N, 1, H, W)
    assert jnp.allclose(out, ref, atol=1e-5, rtol=1e-5), "mismatch vs reference"

    print("KERNEL_OK")
</pallas_src>

<mosaic_0001>
module attributes {stable_mosaic.version = 11 : i64} {
  func.func @_pool_kernel(%arg0: i32, %arg1: i32, %arg2: memref<2x4x256xf32, #tpu.memory_space<vmem>>, %arg3: memref<2x256xf32, #tpu.memory_space<vmem>>, %arg4: memref<2x256xf32, #tpu.memory_space<vmem>>) attributes {dimension_semantics = [#tpu.dimension_semantics<parallel>, #tpu.dimension_semantics<parallel>], iteration_bounds = array<i64: 1, 1>, scalar_prefetch = 0 : i64, scratch_operands = 0 : i64, tpu.core_type = #tpu.core_type<tc>, window_params = [{transform_indices = @transform_0, window_bounds = array<i64: 2, 4, 256>}, {transform_indices = @transform_1, window_bounds = array<i64: 2, 256>}, {transform_indices = @transform_2, window_bounds = array<i64: 2, 256>}]} {
    %c0 = arith.constant 0 : index
    %c0_0 = arith.constant 0 : index
    %c0_1 = arith.constant 0 : index
    %0 = vector.load %arg2[%c0, %c0_0, %c0_1] : memref<2x4x256xf32, #tpu.memory_space<vmem>>, vector<2x4x256xf32>
    %cst = arith.constant dense<0.000000e+00> : vector<2x256xf32>
    %1 = vector.multi_reduction <add>, %0, %cst [1] : vector<2x4x256xf32> to vector<2x256xf32>
    %cst_2 = arith.constant 4.000000e+00 : f32
    %2 = vector.broadcast %cst_2 : f32 to vector<2x256xf32>
    %3 = arith.divf %1, %2 : vector<2x256xf32>
    %c0_3 = arith.constant 0 : index
    %c0_4 = arith.constant 0 : index
    %4 = vector.load %arg3[%c0_3, %c0_4] : memref<2x256xf32, #tpu.memory_space<vmem>>, vector<2x256xf32>
    tpu.vector_store %arg3[%c0_3, %c0_4], %3 {strides = array<i32>} : memref<2x256xf32, #tpu.memory_space<vmem>>, vector<2x256xf32>,
    %cst_5 = arith.constant dense<0xFF800000> : vector<2x256xf32>
    %5 = vector.multi_reduction <maximumf>, %0, %cst_5 [1] : vector<2x4x256xf32> to vector<2x256xf32>
    %c0_6 = arith.constant 0 : index
    %c0_7 = arith.constant 0 : index
    %6 = vector.load %arg4[%c0_6, %c0_7] : memref<2x256xf32, #tpu.memory_space<vmem>>, vector<2x256xf32>
    tpu.vector_store %arg4[%c0_6, %c0_7], %5 {strides = array<i32>} : memref<2x256xf32, #tpu.memory_space<vmem>>, vector<2x256xf32>,
    return
  }
  func.func @transform_0(%arg0: i32, %arg1: i32) -> (i32, i32, i32) {
    %c0_i32 = arith.constant 0 : i32
    %c0_i32_0 = arith.constant 0 : i32
    return %arg0, %c0_i32, %arg1 : i32, i32, i32
  }
  func.func @transform_1(%arg0: i32, %arg1: i32) -> (i32, i32) {
    %c0_i32 = arith.constant 0 : i32
    return %arg0, %arg1 : i32, i32
  }
  func.func @transform_2(%arg0: i32, %arg1: i32) -> (i32, i32) {
    %c0_i32 = arith.constant 0 : i32
    return %arg0, %arg1 : i32, i32
  }
}

</mosaic_0001>

<bundles_post_ra>
// kernel: tpu_custom_call.1
= control target key start
LH: loop header
LB: loop body
LE: loop exit
PB: predicated region body
PF: predicated region fallthrough
CT: control target
= control target key end

     0   :  { %8 = vsyncpa [#allocation3], 0  ;;  %s306_s0 = inlined_call_operand.hbm [shape: f32[2,4,256], index: 0, kind: input, shape index: {}]   ;;  %s307_s1 = inlined_call_operand.hbm [shape: f32[2,256], index: 1, kind: output, shape index: {0}]   ;;  %s308_s2 = inlined_call_operand.hbm [shape: f32[2,256], index: 2, kind: output, shape index: {1}]  }
   0x1   :  { %9 = vsyncpa [#allocation4], 0 }
   0x2   :  { %10 = vsyncpa [#allocation7], 0  ;;  %s263_s9 = smov [#allocation2]  }
   0x3   :  { %s16_s10 = sshll.u32 %s263_s9, 4  ;;  %s17_s10 = int_to_ptr.vmem [resolvable:$true] %s16_s10 }
   0x4   :  { %s205_s11 = scalar_lea.vmem %s17_s10, 256  ;;  %p210_p1 = scmp.lt.s32.totalorder %s17_s10, %s17_s10 }
   0x5   :  { %p206_p0 = scmp.ne.s32.totalorder %s17_s10, %s205_s11  ;;  %p211_p2 = scmp.lt.s32.totalorder %s205_s11, %s205_s11 }
   0x7   :  { %p212_p3 = por %p211_p2, %p210_p1 }
   0x9   :  { %p213_p4 = pnand %p212_p3, %p206_p0 }
   0xb   :  { %216 = shalt.err (!%p213_p4)
}
   0xc   :  { %s264_s12 = smov 128   ;;  %s265_s13 = smov 8  }
   0xd   :  { %22 = dma.hbm_to_vmem [thread:$0]  %s306_s0, 256, %s17_s10, [#allocation3], %s264_s12, %s264_s12, %s265_s13  }
   0xe   :  { %257 = dma.done.wait [#allocation3], 256  }
   0xf   :  { %258 = vsyncadd [#allocation3], 4294967040  ;;  %v266_v0 = vmov 1983009808   ;;  %v76_v2 = vlaneseq  ;;  %vm34_vm0 = vcmask 1043456   ;;  %v26_v3 = vld [vmem:[#allocation2] sm:$0xff] }
  0x10   :  { %v287_v1 = vunpack.c.l.s4 %v266_v0  ;;  %v27_v4 = vld [vmem:[#allocation2 + $0x8] sm:$0xff]  ;;  %v30_v7 = vcombine.high %v26_v3, %v26_v3  ;;  %v35_v9 = vsel %vm34_vm0, %v26_v3, 0.0  ;;  %v103_v13 = vsel %vm34_vm0, %v26_v3, -inf  ;;  %s267_s0 = smov [#allocation5]   ;;  %s268_s17 = smov [#allocation6]  }
  0x11   :  { %v77_v6 = vshrl.u32 %v76_v2, 7  ;;  %v31_v8 = vcombine.high %v27_v4, %v27_v4  ;;  %v49_v10 = vsel %vm34_vm0, %v27_v4, 0.0  ;;  %v36_v11 = vrot.slane %v35_v9, 4  ;;  %s166_s16 = sshll.u32 %s267_s0, 4  ;;  %s176_s18 = sshll.u32 %s268_s17, 4  ;;  %s167_s16 = int_to_ptr.vmem [resolvable:$true] %s166_s16  ;;  %s177_s18 = int_to_ptr.vmem [resolvable:$true] %s176_s18 }
  0x12   :  { %v75_v5 = vunpack.c.0.s8 %v287_v1  ;;  %v50_v12 = vrot.slane %v49_v10, 4  ;;  %v117_v14 = vsel %vm34_vm0, %v27_v4, -inf  ;;  %v42_v15 = vsel %vm34_vm0, %v30_v7, 0.0  ;;  %s217_s19 = scalar_lea.vmem %s167_s16, 64  ;;  %p222_p6 = scmp.lt.s32.totalorder %s167_s16, %s167_s16 }
  0x13   :  { %v56_v16 = vsel %vm34_vm0, %v31_v8, 0.0  ;;  %v104_v17 = vrot.slane %v103_v13, 4  ;;  %v110_v18 = vsel %vm34_vm0, %v30_v7, -inf  ;;  %v37_v19 = vadd.f32 %v36_v11, %v35_v9  ;;  %p218_p5 = scmp.ne.s32.totalorder %s167_s16, %s217_s19  ;;  %p223_p7 = scmp.lt.s32.totalorder %s217_s19, %s217_s19 }
  0x14   :  { %v43_v20 = vrot.slane %v42_v15, 4  ;;  %v51_v21 = vadd.f32 %v50_v12, %v49_v10  ;;  %v57_v22 = vrot.slane %v56_v16, 4  ;;  %v111_v24 = vrot.slane %v110_v18, 4 }
  0x15   :  { %v105_v23 = vmax.f32 %v103_v13, %v104_v17  ;;  %v118_v25 = vrot.slane %v117_v14, 4  ;;  %v124_v26 = vsel %vm34_vm0, %v31_v8, -inf  ;;  %v38_v27 = vrot.slane %v37_v19, 2  ;;  %p224_p8 = por %p223_p7, %p222_p6 }
  0x16   :  { %v44_v28 = vadd.f32 %v43_v20, %v42_v15  ;;  %v52_v29 = vrot.slane %v51_v21, 2  ;;  %v58_v30 = vadd.f32 %v57_v22, %v56_v16  ;;  %v112_v32 = vmax.f32 %v110_v18, %v111_v24 }
  0x17   :  { %v106_v31 = vrot.slane %v105_v23, 2  ;;  %v119_v33 = vmax.f32 %v117_v14, %v118_v25  ;;  %v125_v34 = vrot.slane %v124_v26, 4  ;;  %v39_v35 = vadd.f32 %v38_v27, %v37_v19  ;;  %p225_p9 = pnand %p224_p8, %p218_p5 }
  0x18   :  { %v45_v36 = vrot.slane %v44_v28, 2  ;;  %v53_v37 = vadd.f32 %v52_v29, %v51_v21  ;;  %v59_v38 = vrot.slane %v58_v30, 2  ;;  %v113_v40 = vrot.slane %v112_v32, 2 }
  0x19   :  { %v107_v39 = vmax.f32 %v105_v23, %v106_v31  ;;  %v120_v41 = vrot.slane %v119_v33, 2  ;;  %v126_v42 = vmax.f32 %v124_v26, %v125_v34  ;;  %v40_v43 = vrot.slane %v39_v35, 1 }
  0x1a   :  { %v46_v44 = vadd.f32 %v45_v36, %v44_v28  ;;  %v54_v45 = vrot.slane %v53_v37, 1  ;;  %v60_v46 = vadd.f32 %v59_v38, %v58_v30  ;;  %v114_v48 = vmax.f32 %v112_v32, %v113_v40 }
  0x1b   :  { %v108_v47 = vrot.slane %v107_v39, 1  ;;  %v121_v49 = vmax.f32 %v119_v33, %v120_v41  ;;  %v127_v50 = vrot.slane %v126_v42, 2  ;;  %v41_v51 = vadd.f32 %v40_v43, %v39_v35 }
  0x1c   :  { %v47_v52 = vrot.slane %v46_v44, 1  ;;  %v55_v53 = vadd.f32 %v54_v45, %v53_v37  ;;  %v61_v54 = vrot.slane %v60_v46, 1  ;;  %v115_v56 = vrot.slane %v114_v48, 1 }
  0x1d   :  { %v109_v55 = vmax.f32 %v107_v39, %v108_v47  ;;  %v122_v57 = vrot.slane %v121_v49, 1  ;;  %v128_v58 = vmax.f32 %v126_v42, %v127_v50  ;;  %v64_v61 = vmul.f32 0.25, %v41_v51 }
  0x1e   :  { %v48_v59 = vadd.f32 %v47_v52, %v46_v44  ;;  %v62_v60 = vadd.f32 %v61_v54, %v60_v46  ;;  %v66_v62 = vmul.f32 0.25, %v55_v53  ;;  %v116_v63 = vmax.f32 %v114_v48, %v115_v56 }
  0x1f   :  { %v123_v0 = vmax.f32 %v121_v49, %v122_v57  ;;  %v129_v2 = vrot.slane %v128_v58, 1  ;;  %v78_v7 = vsub.s32 %v75_v5, %v77_v6  ;;  %vm93_vm1 = vcmask 1041409  }
  0x20   :  { %v65_v3 = vmul.f32 0.25, %v48_v59  ;;  %v67_v4 = vmul.f32 0.25, %v62_v60  ;;  %v135_v9 = vcombine.low %v109_v55, %v116_v63  ;;  %vm95_vm2 = vcmask 1043459  }
  0x21   :  { %v130_v8 = vmax.f32 %v128_v58, %v129_v2  ;;  %vm97_vm3 = vcmask 1045509   ;;  %vm99_vm4 = vcmask 1047559  }
  0x22   :  { %v72_v10 = vcombine.low %v64_v61, %v65_v3  ;;  %v80_v11 = vcombine.low %v66_v62, %v67_v4  ;;  %v142_v15 = vrot.slane %v135_v9, %v78_v7 }
  0x23   :  { %v143_v12 = vcombine.low %v123_v0, %v130_v8 }
  0x24   :  { %v79_v13 = vrot.slane %v72_v10, %v78_v7  ;;  %v87_v14 = vrot.slane %v80_v11, %v78_v7 }
  0x25   :  { %v150_v16 = vrot.slane %v143_v12, %v78_v7 }
  0x26   :  { %v92_v17 = vrot.slane %v87_v14, 7 }
  0x27   :  { %v153_v18 = vrot.slane %v150_v16, 7 }
  0x28   :  { %v94_v19 = vsel %vm93_vm1, %v92_v17, %v79_v13 }
  0x29   :  { %v96_v1 = vsel %vm95_vm2, %v92_v17, %v94_v19  ;;  %v154_v5 = vsel %vm93_vm1, %v153_v18, %v142_v15 }
  0x2a   :  { %v98_v6 = vsel %vm97_vm3, %v92_v17, %v96_v1  ;;  %v155_v20 = vsel %vm95_vm2, %v153_v18, %v154_v5 }
  0x2b   :  { %v100_v21 = vsel %vm99_vm4, %v92_v17, %v98_v6  ;;  %v156_v22 = vsel %vm97_vm3, %v153_v18, %v155_v20 }
  0x2c   :  { %102 = vst [vmem:[#allocation5] sm:$0xf] %v100_v21  ;;  %v157_v23 = vsel %vm99_vm4, %v153_v18, %v156_v22 }
  0x2d   :  { %159 = vst [vmem:[#allocation6] sm:$0xf] %v157_v23 }
  0x2e   :  { %228 = shalt.err (!%p225_p9)
}
  0x2f   :  { %169 = dma.vmem_to_hbm [thread:$0]  %s167_s16, 64, %s307_s1, [#allocation4]  }
  0x30   :  { %s237_s22 = scalar_lea.vmem %s177_s18, 64  ;;  %p242_p11 = scmp.lt.s32.totalorder %s177_s18, %s177_s18 }
  0x31   :  { %p238_p10 = scmp.ne.s32.totalorder %s177_s18, %s237_s22  ;;  %p243_p12 = scmp.lt.s32.totalorder %s237_s22, %s237_s22 }
  0x33   :  { %p244_p13 = por %p243_p12, %p242_p11 }
  0x35   :  { %p245_p0 = pnand %p244_p13, %p238_p10 }
  0x37   :  { %248 = shalt.err (!%p245_p0)
}
  0x38   :  { %179 = dma.vmem_to_hbm [thread:$0]  %s177_s18, 64, %s308_s2, [#allocation7]  }
  0x39   :  { %259 = dma.done.wait [#allocation4], 64  }
  0x3a   :  { %260 = vsyncadd [#allocation4], 4294967232 }
  0x3b   :  { %261 = dma.done.wait [#allocation7], 64  }
  0x3c   :  { %262 = vsyncadd [#allocation7], 4294967232 }
  0x3d   :  { %186 = vsyncpa [#allocation3], 1 }
  0x3e   :  { %187 = vsyncpa [#allocation4], 1 }
  0x3f   :  { %188 = vsyncpa [#allocation7], 1 }

</bundles_post_ra>
